<compile_context>
chip_gen: v7x
topology: tpu7x:2x2x1
jax: 0.10.0
libtpu: 0.0.40
codegen_flags: <defaults>
</compile_context>

<pallas_src>
import functools

import jax
import jax.numpy as jnp
from jax.experimental import pallas as pl
from jax.experimental.pallas import tpu as pltpu

DEFAULT_TB = 1024   # batch tile (rows); multiple of 16 for bf16 sublane packing
OUT_PAD = 8         # final logits (3) padded to 8 lanes for a legal, tiny output


def _round_up(n, m):
    return ((n + m - 1) // m) * m


# --------------------------------------------------------------------------
# Kernel
# --------------------------------------------------------------------------
def ddosnet_kernel(x_ref,
                   w1_ref, b1_ref,
                   w2_ref, b2_ref,
                   w3_ref, b3_ref,
                   w4_ref, b4_ref,
                   w5_ref, b5_ref,
                   out_ref):
    """Fused MLP forward: 4x (bf16 matmul + f32 bias + ReLU) + final layer."""
    h = x_ref[...]  # bf16 (TB, F)

    h = jnp.dot(h, w1_ref[...], preferred_element_type=jnp.float32) + b1_ref[...]
    h = jnp.maximum(h, 0.0).astype(jnp.bfloat16)
    # dropout(p=0.5): identity in eval mode

    h = jnp.dot(h, w2_ref[...], preferred_element_type=jnp.float32) + b2_ref[...]
    h = jnp.maximum(h, 0.0).astype(jnp.bfloat16)

    h = jnp.dot(h, w3_ref[...], preferred_element_type=jnp.float32) + b3_ref[...]
    h = jnp.maximum(h, 0.0).astype(jnp.bfloat16)

    h = jnp.dot(h, w4_ref[...], preferred_element_type=jnp.float32) + b4_ref[...]
    h = jnp.maximum(h, 0.0).astype(jnp.bfloat16)

    out = jnp.dot(h, w5_ref[...], preferred_element_type=jnp.float32) + b5_ref[...]
    out_ref[...] = out  # f32 (TB, 8); wrapper slices to 3 logits


# --------------------------------------------------------------------------
# Parameters
# --------------------------------------------------------------------------
def init_params(key, input_size):
    """Deterministic synthetic parameters, PyTorch-init-like, stored (in, out)."""
    dims = [input_size, 256, 128, 64, 32, 3]
    params = []
    for i in range(5):
        key, kw, kb = jax.random.split(key, 3)
        bound = 1.0 / jnp.sqrt(dims[i])
        w = jax.random.uniform(kw, (dims[i], dims[i + 1]),
                               minval=-bound, maxval=bound, dtype=jnp.float32)
        b = jax.random.uniform(kb, (1, dims[i + 1]),
                               minval=-bound, maxval=bound, dtype=jnp.float32)
        params.append((w, b))
    return params, dims


def prepare_params(params, dims):
    """Cast weights to bf16 (biases stay f32). Only the final layer's output
    dim is zero-padded (3 -> OUT_PAD) so the kernel can write a tiny
    contiguous output slab. All other dims stay unpadded: weight blocks cover
    the full arrays, which is always a legal BlockSpec, and the parameters are
    VMEM-resident so padding them would only add bytes."""
    prepared = []
    for i, (w, b) in enumerate(params):
        if i == 4:  # final layer: pad output columns 3 -> OUT_PAD
            din, dout = dims[i], dims[i + 1]
            wp = jnp.zeros((din, OUT_PAD), jnp.float32).at[:, :dout].set(w)
            bp = jnp.zeros((1, OUT_PAD), jnp.float32).at[:, :dout].set(b)
            prepared.append((wp.astype(jnp.bfloat16), bp))
        else:
            prepared.append((w.astype(jnp.bfloat16), b))
    return prepared


# --------------------------------------------------------------------------
# Forward wrapper
# --------------------------------------------------------------------------
@functools.partial(jax.jit, static_argnames=("in_features", "tb"))
def ddosnet_forward(x, prepared, *, in_features, tb=DEFAULT_TB):
    B, F = x.shape
    assert F == in_features

    # Batch tile: multiple of 16 (bf16 packed rows), capped by the padded batch.
    tb_eff = min(_round_up(tb, 16), _round_up(B, 16))
    b_pad = _round_up(B, tb_eff)

    # Only the batch rows are padded; features stay unpadded (block last dim
    # equals the full array dim, so no 128-lane requirement applies).
    xp = jnp.zeros((b_pad, F), jnp.bfloat16).at[:B, :].set(x.astype(jnp.bfloat16))

    operands = [xp]
    for w, b in prepared:
        operands += [w, b]

    x_spec = pl.BlockSpec((tb_eff, F), lambda i: (i, 0))
    const_map = lambda i: (0, 0)  # weights/biases resident across all tiles
    in_specs = [x_spec]
    for w, b in prepared:
        in_specs.append(pl.BlockSpec(w.shape, const_map))
        in_specs.append(pl.BlockSpec(b.shape, const_map))
    out_spec = pl.BlockSpec((tb_eff, OUT_PAD), lambda i: (i, 0))

    dims_eff = [F, 256, 128, 64, 32, OUT_PAD]
    flops = 2 * b_pad * sum(dims_eff[i] * dims_eff[i + 1] for i in range(5))
    bytes_accessed = (xp.size * 2 + b_pad * OUT_PAD * 4
                      + sum(w.size * 2 + b.size * 4 for w, b in prepared))

    out = pl.pallas_call(
        ddosnet_kernel,
        out_shape=jax.ShapeDtypeStruct((b_pad, OUT_PAD), jnp.float32),
        grid=(b_pad // tb_eff,),
        in_specs=in_specs,
        out_specs=out_spec,
        compiler_params=pltpu.CompilerParams(
            dimension_semantics=("parallel",),   # dual-TC sharding on v7x (grid>=2)
            vmem_limit_bytes=16 * 1024 * 1024,   # actual use is a few MiB at TB<=2048
        ),
        cost_estimate=pl.CostEstimate(
            flops=flops, transcendentals=0, bytes_accessed=bytes_accessed),
    )(*operands)

    return out[:B, :3]


# --------------------------------------------------------------------------
# Reference (emulates the kernel's bf16-in / f32-accumulate numerics)
# --------------------------------------------------------------------------
def ddosnet_ref(x, prepared):
    h = x.astype(jnp.bfloat16)
    for i, (w, b) in enumerate(prepared):
        h = jnp.dot(h.astype(jnp.float32), w.astype(jnp.float32)) + b
        if i < 4:
            h = jnp.maximum(h, 0.0).astype(jnp.bfloat16)
    return h[:, :3]


if __name__ == "__main__":
    key = jax.random.PRNGKey(0)
    k_param, k_x = jax.random.split(key)

    batch = 300        # non-multiple of the tile: exercises batch padding
    input_size = 64    # unpadded feature dim (full-dim block is legal)

    params, dims = init_params(k_param, input_size)
    prepared = prepare_params(params, dims)

    x = jax.random.normal(k_x, (batch, input_size), dtype=jnp.float32)

    # tb=128 at this small demo batch -> b_pad=384, grid of 3: exercises the
    # batch-tiled pipeline and resident-weight path. Production default is 1024.
    out = ddosnet_forward(x, prepared, in_features=input_size, tb=128)
    out = jax.block_until_ready(out)

    ref = ddosnet_ref(x, prepared)
    assert out.shape == (batch, 3), out.shape
    assert jnp.allclose(out, ref, atol=1e-2, rtol=1e-2), "mismatch vs reference"

    print("KERNEL_OK")
</pallas_src>

<mosaic_0001>
module attributes {stable_mosaic.version = 11 : i64} {
  func.func @ddosnet_kernel(%arg0: i32, %arg1: memref<128x64xbf16, #tpu.memory_space<vmem>>, %arg2: memref<64x256xbf16, #tpu.memory_space<vmem>>, %arg3: memref<1x256xf32, #tpu.memory_space<vmem>>, %arg4: memref<256x128xbf16, #tpu.memory_space<vmem>>, %arg5: memref<1x128xf32, #tpu.memory_space<vmem>>, %arg6: memref<128x64xbf16, #tpu.memory_space<vmem>>, %arg7: memref<1x64xf32, #tpu.memory_space<vmem>>, %arg8: memref<64x32xbf16, #tpu.memory_space<vmem>>, %arg9: memref<1x32xf32, #tpu.memory_space<vmem>>, %arg10: memref<32x8xbf16, #tpu.memory_space<vmem>>, %arg11: memref<1x8xf32, #tpu.memory_space<vmem>>, %arg12: memref<128x8xf32, #tpu.memory_space<vmem>>) attributes {dimension_semantics = [#tpu.dimension_semantics<parallel>], iteration_bounds = array<i64: 3>, scalar_prefetch = 0 : i64, scratch_operands = 0 : i64, tpu.core_type = #tpu.core_type<tc>, window_params = [{transform_indices = @transform_0, window_bounds = array<i64: 128, 64>}, {pipeline_mode = #tpu.pipeline_mode<synchronous>, transform_indices = @transform_1, window_bounds = array<i64: 64, 256>}, {pipeline_mode = #tpu.pipeline_mode<synchronous>, transform_indices = @transform_2, window_bounds = array<i64: 1, 256>}, {pipeline_mode = #tpu.pipeline_mode<synchronous>, transform_indices = @transform_3, window_bounds = array<i64: 256, 128>}, {pipeline_mode = #tpu.pipeline_mode<synchronous>, transform_indices = @transform_4, window_bounds = array<i64: 1, 128>}, {pipeline_mode = #tpu.pipeline_mode<synchronous>, transform_indices = @transform_5, window_bounds = array<i64: 128, 64>}, {pipeline_mode = #tpu.pipeline_mode<synchronous>, transform_indices = @transform_6, window_bounds = array<i64: 1, 64>}, {pipeline_mode = #tpu.pipeline_mode<synchronous>, transform_indices = @transform_7, window_bounds = array<i64: 64, 32>}, {pipeline_mode = #tpu.pipeline_mode<synchronous>, transform_indices = @transform_8, window_bounds = array<i64: 1, 32>}, {pipeline_mode = #tpu.pipeline_mode<synchronous>, transform_indices = @transform_9, window_bounds = array<i64: 32, 8>}, {pipeline_mode = #tpu.pipeline_mode<synchronous>, transform_indices = @transform_10, window_bounds = array<i64: 1, 8>}, {transform_indices = @transform_11, window_bounds = array<i64: 128, 8>}]} {
    %c0 = arith.constant 0 : index
    %c0_0 = arith.constant 0 : index
    %0 = vector.load %arg1[%c0, %c0_0] : memref<128x64xbf16, #tpu.memory_space<vmem>>, vector<128x64xbf16>
    %c0_1 = arith.constant 0 : index
    %c0_2 = arith.constant 0 : index
    %1 = vector.load %arg2[%c0_1, %c0_2] : memref<64x256xbf16, #tpu.memory_space<vmem>>, vector<64x256xbf16>
    %cst = arith.constant dense<0.000000e+00> : vector<128x256xf32>
    %2 = tpu.matmul %0, %1, %cst {dimension_numbers = #tpu.dot_dimension_numbers<[1], [0], [0], [1], [0, 0, 1, 1], [], []>} : vector<128x64xbf16>, vector<64x256xbf16>, vector<128x256xf32> -> vector<128x256xf32>
    %c0_3 = arith.constant 0 : index
    %c0_4 = arith.constant 0 : index
    %3 = vector.load %arg3[%c0_3, %c0_4] : memref<1x256xf32, #tpu.memory_space<vmem>>, vector<1x256xf32>
    %4 = vector.broadcast %3 : vector<1x256xf32> to vector<128x256xf32>
    %5 = arith.addf %2, %4 : vector<128x256xf32>
    %cst_5 = arith.constant 0.000000e+00 : f32
    %6 = vector.broadcast %cst_5 : f32 to vector<128x256xf32>
    %7 = arith.maximumf %5, %6 : vector<128x256xf32>
    %8 = arith.truncf %7 : vector<128x256xf32> to vector<128x256xbf16>
    %c0_6 = arith.constant 0 : index
    %c0_7 = arith.constant 0 : index
    %9 = vector.load %arg4[%c0_6, %c0_7] : memref<256x128xbf16, #tpu.memory_space<vmem>>, vector<256x128xbf16>
    %cst_8 = arith.constant dense<0.000000e+00> : vector<128x128xf32>
    %10 = tpu.matmul %8, %9, %cst_8 {dimension_numbers = #tpu.dot_dimension_numbers<[1], [0], [0], [1], [0, 0, 1, 1], [], []>} : vector<128x256xbf16>, vector<256x128xbf16>, vector<128x128xf32> -> vector<128x128xf32>
    %c0_9 = arith.constant 0 : index
    %c0_10 = arith.constant 0 : index
    %11 = vector.load %arg5[%c0_9, %c0_10] : memref<1x128xf32, #tpu.memory_space<vmem>>, vector<1x128xf32>
    %12 = vector.broadcast %11 : vector<1x128xf32> to vector<128x128xf32>
    %13 = arith.addf %10, %12 : vector<128x128xf32>
    %cst_11 = arith.constant 0.000000e+00 : f32
    %14 = vector.broadcast %cst_11 : f32 to vector<128x128xf32>
    %15 = arith.maximumf %13, %14 : vector<128x128xf32>
    %16 = arith.truncf %15 : vector<128x128xf32> to vector<128x128xbf16>
    %c0_12 = arith.constant 0 : index
    %c0_13 = arith.constant 0 : index
    %17 = vector.load %arg6[%c0_12, %c0_13] : memref<128x64xbf16, #tpu.memory_space<vmem>>, vector<128x64xbf16>
    %cst_14 = arith.constant dense<0.000000e+00> : vector<128x64xf32>
    %18 = tpu.matmul %16, %17, %cst_14 {dimension_numbers = #tpu.dot_dimension_numbers<[1], [0], [0], [1], [0, 0, 1, 1], [], []>} : vector<128x128xbf16>, vector<128x64xbf16>, vector<128x64xf32> -> vector<128x64xf32>
    %c0_15 = arith.constant 0 : index
    %c0_16 = arith.constant 0 : index
    %19 = vector.load %arg7[%c0_15, %c0_16] : memref<1x64xf32, #tpu.memory_space<vmem>>, vector<1x64xf32>
    %20 = vector.broadcast %19 : vector<1x64xf32> to vector<128x64xf32>
    %21 = arith.addf %18, %20 : vector<128x64xf32>
    %cst_17 = arith.constant 0.000000e+00 : f32
    %22 = vector.broadcast %cst_17 : f32 to vector<128x64xf32>
    %23 = arith.maximumf %21, %22 : vector<128x64xf32>
    %24 = arith.truncf %23 : vector<128x64xf32> to vector<128x64xbf16>
    %c0_18 = arith.constant 0 : index
    %c0_19 = arith.constant 0 : index
    %25 = vector.load %arg8[%c0_18, %c0_19] : memref<64x32xbf16, #tpu.memory_space<vmem>>, vector<64x32xbf16>
    %cst_20 = arith.constant dense<0.000000e+00> : vector<128x32xf32>
    %26 = tpu.matmul %24, %25, %cst_20 {dimension_numbers = #tpu.dot_dimension_numbers<[1], [0], [0], [1], [0, 0, 1, 1], [], []>} : vector<128x64xbf16>, vector<64x32xbf16>, vector<128x32xf32> -> vector<128x32xf32>
    %c0_21 = arith.constant 0 : index
    %c0_22 = arith.constant 0 : index
    %27 = vector.load %arg9[%c0_21, %c0_22] : memref<1x32xf32, #tpu.memory_space<vmem>>, vector<1x32xf32>
    %28 = vector.broadcast %27 : vector<1x32xf32> to vector<128x32xf32>
    %29 = arith.addf %26, %28 : vector<128x32xf32>
    %cst_23 = arith.constant 0.000000e+00 : f32
    %30 = vector.broadcast %cst_23 : f32 to vector<128x32xf32>
    %31 = arith.maximumf %29, %30 : vector<128x32xf32>
    %32 = arith.truncf %31 : vector<128x32xf32> to vector<128x32xbf16>
    %c0_24 = arith.constant 0 : index
    %c0_25 = arith.constant 0 : index
    %33 = vector.load %arg10[%c0_24, %c0_25] : memref<32x8xbf16, #tpu.memory_space<vmem>>, vector<32x8xbf16>
    %cst_26 = arith.constant dense<0.000000e+00> : vector<128x8xf32>
    %34 = tpu.matmul %32, %33, %cst_26 {dimension_numbers = #tpu.dot_dimension_numbers<[1], [0], [0], [1], [0, 0, 1, 1], [], []>} : vector<128x32xbf16>, vector<32x8xbf16>, vector<128x8xf32> -> vector<128x8xf32>
    %c0_27 = arith.constant 0 : index
    %c0_28 = arith.constant 0 : index
    %35 = vector.load %arg11[%c0_27, %c0_28] : memref<1x8xf32, #tpu.memory_space<vmem>>, vector<1x8xf32>
    %36 = vector.broadcast %35 : vector<1x8xf32> to vector<128x8xf32>
    %37 = arith.addf %34, %36 : vector<128x8xf32>
    %c0_29 = arith.constant 0 : index
    %c0_30 = arith.constant 0 : index
    %38 = vector.load %arg12[%c0_29, %c0_30] : memref<128x8xf32, #tpu.memory_space<vmem>>, vector<128x8xf32>
    tpu.vector_store %arg12[%c0_29, %c0_30], %37 {strides = array<i32>} : memref<128x8xf32, #tpu.memory_space<vmem>>, vector<128x8xf32>,
    return
  }
  func.func @transform_0(%arg0: i32) -> (i32, i32) {
    %c0_i32 = arith.constant 0 : i32
    %c0_i32_0 = arith.constant 0 : i32
    return %arg0, %c0_i32 : i32, i32
  }
  func.func @transform_1(%arg0: i32) -> (i32, i32) {
    %c0_i32 = arith.constant 0 : i32
    %c0_i32_0 = arith.constant 0 : i32
    %c0_i32_1 = arith.constant 0 : i32
    return %c0_i32, %c0_i32_0 : i32, i32
  }
  func.func @transform_2(%arg0: i32) -> (i32, i32) {
    %c0_i32 = arith.constant 0 : i32
    %c0_i32_0 = arith.constant 0 : i32
    %c0_i32_1 = arith.constant 0 : i32
    return %c0_i32, %c0_i32_0 : i32, i32
  }
  func.func @transform_3(%arg0: i32) -> (i32, i32) {
    %c0_i32 = arith.constant 0 : i32
    %c0_i32_0 = arith.constant 0 : i32
    %c0_i32_1 = arith.constant 0 : i32
    return %c0_i32, %c0_i32_0 : i32, i32
  }
  func.func @transform_4(%arg0: i32) -> (i32, i32) {
    %c0_i32 = arith.constant 0 : i32
    %c0_i32_0 = arith.constant 0 : i32
    %c0_i32_1 = arith.constant 0 : i32
    return %c0_i32, %c0_i32_0 : i32, i32
  }
  func.func @transform_5(%arg0: i32) -> (i32, i32) {
    %c0_i32 = arith.constant 0 : i32
    %c0_i32_0 = arith.constant 0 : i32
    %c0_i32_1 = arith.constant 0 : i32
    return %c0_i32, %c0_i32_0 : i32, i32
  }
  func.func @transform_6(%arg0: i32) -> (i32, i32) {
    %c0_i32 = arith.constant 0 : i32
    %c0_i32_0 = arith.constant 0 : i32
    %c0_i32_1 = arith.constant 0 : i32
    return %c0_i32, %c0_i32_0 : i32, i32
  }
  func.func @transform_7(%arg0: i32) -> (i32, i32) {
    %c0_i32 = arith.constant 0 : i32
    %c0_i32_0 = arith.constant 0 : i32
    %c0_i32_1 = arith.constant 0 : i32
    return %c0_i32, %c0_i32_0 : i32, i32
  }
  func.func @transform_8(%arg0: i32) -> (i32, i32) {
    %c0_i32 = arith.constant 0 : i32
    %c0_i32_0 = arith.constant 0 : i32
    %c0_i32_1 = arith.constant 0 : i32
    return %c0_i32, %c0_i32_0 : i32, i32
  }
  func.func @transform_9(%arg0: i32) -> (i32, i32) {
    %c0_i32 = arith.constant 0 : i32
    %c0_i32_0 = arith.constant 0 : i32
    %c0_i32_1 = arith.constant 0 : i32
    return %c0_i32, %c0_i32_0 : i32, i32
  }
  func.func @transform_10(%arg0: i32) -> (i32, i32) {
    %c0_i32 = arith.constant 0 : i32
    %c0_i32_0 = arith.constant 0 : i32
    %c0_i32_1 = arith.constant 0 : i32
    return %c0_i32, %c0_i32_0 : i32, i32
  }
  func.func @transform_11(%arg0: i32) -> (i32, i32) {
    %c0_i32 = arith.constant 0 : i32
    %c0_i32_0 = arith.constant 0 : i32
    return %arg0, %c0_i32 : i32, i32
  }
}

</mosaic_0001>

<bundles_post_ra>
// kernel: ddosnet_forward.1
= control target key start
LH: loop header
LB: loop body
LE: loop exit
PB: predicated region body
PF: predicated region fallthrough
CT: control target
= control target key end

     0   :  { %s1938_s17 = smov 0   ;;  %s2218_s0 = inlined_call_operand.vmem [shape: bf16[384,64], index: 0, kind: input, shape index: {}]   ;;  %s2219_s1 = inlined_call_operand.vmem [shape: bf16[64,256], index: 1, kind: input, shape index: {}]   ;;  %s2220_s2 = inlined_call_operand.vmem [shape: f32[1,256], index: 2, kind: input, shape index: {}]   ;;  %s2221_s3 = inlined_call_operand.vmem [shape: bf16[256,128], index: 3, kind: input, shape index: {}]   ;;  %s2222_s4 = inlined_call_operand.vmem [shape: f32[1,128], index: 4, kind: input, shape index: {}]   ;;  %s2223_s5 = inlined_call_operand.vmem [shape: bf16[128,64], index: 5, kind: input, shape index: {}]   ;;  %s2224_s6 = inlined_call_operand.vmem [shape: f32[1,64], index: 6, kind: input, shape index: {}]   ;;  %s2225_s7 = inlined_call_operand.vmem [shape: bf16[64,32], index: 7, kind: input, shape index: {}]   ;;  %s2226_s8 = inlined_call_operand.vmem [shape: f32[1,32], index: 8, kind: input, shape index: {}]   ;;  %s2227_s9 = inlined_call_operand.vmem [shape: bf16[32,8], index: 9, kind: input, shape index: {}]   ;;  %s2228_s10 = inlined_call_operand.vmem [shape: f32[1,8], index: 10, kind: input, shape index: {}]   ;;  %s2229_s11 = inlined_call_operand.vmem [shape: f32[384,8], index: 11, kind: output, shape index: {}]  }
   0x1 LB: > { %s1543_s18 = sadd.s32 4294967295, %s1875_s17   ;;  %p1547_p0 = scmp.ge.s32.totalorder %s1875_s17, 1  ;;  %s1875_s17 = sphi %s1938_s17, %s21_s17  }
   0x2   : > { %p338_p1 = scmp.lt.s32.totalorder %s1875_s17, 4 }
   0x4   : > { %p339_p2 = pnand %p1547_p0, %p338_p1 }
   0x5   : > { %v1819_v0 = vld [vmem:[%s2219_s1 + $0x4] ss:$8 sps:$4 sm:$0xff] (!%p339_p2)   ;;  %s1548_s21 = sshll.u32 (!%p339_p2), %s1543_s18, 4  ;;  %v1821_v1 = vld [vmem:[%s2219_s1] ss:$8 sps:$4 sm:$0xff] (!%p339_p2)   ;;  %v1877_v2 = vmov (!%p339_p2), 0   ;;  %v417_v36 = vlaneseq (!%p339_p2) }
   0x6   : > { %342 = sbr.rel (%p339_p2) target bundleno = 1185 (0x4a1), region = 64  ;;  %564 = vmatprep.mubr.bf16.mxu0 (!%p339_p2), %v1877_v2  ;;  %p379_p3 = scmp.lt.s32.totalorder (!%p339_p2), %s1548_s21, 47  ;;  %532 = vmatprep.subr.bf16.mxu0 (!%p339_p2), %v1819_v0  ;;  %v1822_v3 = vld [vmem:[%s2219_s1 + $0x14] ss:$8 sps:$4 sm:$0xff] (!%p339_p2)   ;;  %v1824_v4 = vld [vmem:[%s2219_s1 + $0x10] ss:$8 sps:$4 sm:$0xff] (!%p339_p2)  }
   0x7   : > { %533 = vmatpush1.bf16.msra.mxu0 (!%p339_p2), %v1821_v1  ;;  %v1825_v5 = vld [vmem:[%s2219_s1 + $0x24] ss:$8 sps:$4 sm:$0xff] (!%p339_p2)   ;;  %v1827_v7 = vld [vmem:[%s2219_s1 + $0x20] ss:$8 sps:$4 sm:$0xff] (!%p339_p2)   ;;  %v1828_v8 = vld [vmem:[%s2219_s1 + $0x34] ss:$8 sps:$4 sm:$0xff] (!%p339_p2)  }
   0x8   : > { %534 = vmatprep.subr.bf16.mxu0 (!%p339_p2), %v1822_v3  ;;  %v1839_v6 = vld [vmem:[%s2221_s3 + $0x40] sm:$0xff] (!%p339_p2)   ;;  %v1830_v9 = vld [vmem:[%s2219_s1 + $0x30] ss:$8 sps:$4 sm:$0xff] (!%p339_p2)   ;;  %vm507_vm0 = vcmask (!%p339_p2), 523264   ;;  %v1841_v12 = vld [vmem:[%s2221_s3 + $0x48] sm:$0xff] (!%p339_p2)   ;;  %v418_v37 = vshrl.u32 (!%p339_p2), %v417_v36, 7 }
   0x9   : > { %1628 = vmatprep.subr.bf16.mxu1 (!%p339_p2), %v1839_v6  ;;  %v1840_v11 = vld [vmem:[%s2221_s3] sm:$0xff] (!%p339_p2)   ;;  %v1842_v13 = vld [vmem:[%s2221_s3 + $0x8] sm:$0xff] (!%p339_p2)   ;;  %v1843_v14 = vld [vmem:[%s2221_s3 + $0x50] sm:$0xff] (!%p339_p2)   ;;  %vm1348_vm1 = vcmask (!%p339_p2), 261120   ;;  %vm1470_vm2 = vcmask (!%p339_p2), 64512  }
   0xa   : > { %1629 = vmatpush3.bf16.msra.mxu1 (!%p339_p2), %v1840_v11  ;;  %v1844_v16 = vld [vmem:[%s2221_s3 + $0x10] sm:$0xff] (!%p339_p2)   ;;  %v1845_v17 = vld [vmem:[%s2221_s3 + $0x58] sm:$0xff] (!%p339_p2)   ;;  %v1847_v19 = vld [vmem:[%s2221_s3 + $0x60] sm:$0xff] (!%p339_p2)   ;;  %v419_v38 = vsub.s32 (!%p339_p2), 0, %v418_v37  ;;  %v423_v40 = vsub.s32 (!%p339_p2), 1, %v418_v37 }
   0xb   : > { %535 = vmatpush1.bf16.msra.mxu0 (!%p339_p2), %v1824_v4  ;;  %1630 = vmatprep.subr.bf16.mxu1 (!%p339_p2), %v1841_v12  ;;  %v1846_v18 = vld [vmem:[%s2221_s3 + $0x18] sm:$0xff] (!%p339_p2)   ;;  %v1848_v20 = vld [vmem:[%s2221_s3 + $0x20] sm:$0xff] (!%p339_p2)   ;;  %v1849_v22 = vld [vmem:[%s2221_s3 + $0x68] sm:$0xff] (!%p339_p2)  }
   0xc   : > { %536 = vmatprep.subr.bf16.mxu0 (!%p339_p2), %v1825_v5  ;;  %v1850_v28 = vld [vmem:[%s2221_s3 + $0x28] sm:$0xff] (!%p339_p2)   ;;  %v1851_v29 = vld [vmem:[%s2221_s3 + $0x70] sm:$0xff] (!%p339_p2)   ;;  %v1853_v31 = vld [vmem:[%s2221_s3 + $0x78] sm:$0xff] (!%p339_p2)  }
   0xd   : > { %s2231_s21 = smov (!%p379_p3, %s1548_s21), 47  ;;  %v1852_v30 = vld [vmem:[%s2221_s3 + $0x30] sm:$0xff]   ;;  %v1854_v32 = vld [vmem:[%s2221_s3 + $0x38] sm:$0xff]   ;;  %v1855_v33 = vld [vmem:[%s2223_s5] sm:$0xff]  }
   0xe   : > { %s1549_s30 = sshll.u32 %s2231_s21, 2  ;;  %1631 = vmatpush3.bf16.msra.mxu1 %v1842_v13  ;;  %v1856_v34 = vld [vmem:[%s2223_s5 + $0x8] sm:$0xff]   ;;  %v1857_v35 = vld [vmem:[%s2223_s5 + $0x10] sm:$0xff]   ;;  %v415_v39 = vld [vmem:[%s2220_s2] sm:$0x3]  ;;  %s1551_s24 = sshll.u32 %s2231_s21, 3 }
   0xf   : > { %s1971_s16 = scalar_lea.vmem %s2218_s0, %s1549_s30  ;;  %537 = vmatpush1.bf16.msra.mxu0 %v1827_v7  ;;  %1632 = vmatprep.subr.bf16.mxu1 %v1843_v14  ;;  %v2062_v41 = vrot.slane %v415_v39, %v419_v38  ;;  %v2064_v42 = vrot.slane %v415_v39, %v423_v40  ;;  %s2181_s29 = scalar_lea.vmem %s2229_s11, %s1551_s24 }
  0x10   : > { %538 = vmatprep.subr.bf16.mxu0 %v1828_v8  ;;  %v1831_v10 = vld [vmem:[%s1971_s16] sm:$0xff]   ;;  %v1832_v15 = vld [vmem:[%s1971_s16 + $0x8] sm:$0xff]   ;;  %v1833_v21 = vld [vmem:[%s1971_s16 + $0x10] sm:$0xff]  }
  0x11   : > { %v1834_v23 = vld [vmem:[%s1971_s16 + $0x18] sm:$0xff]   ;;  %v1835_v24 = vld [vmem:[%s1971_s16 + $0x20] sm:$0xff]   ;;  %v1836_v25 = vld [vmem:[%s1971_s16 + $0x28] sm:$0xff]  }
  0x12   : > { %1633 = vmatpush3.bf16.msra.mxu1 %v1844_v16  ;;  %v1837_v26 = vld [vmem:[%s1971_s16 + $0x30] sm:$0xff]   ;;  %v1838_v27 = vld [vmem:[%s1971_s16 + $0x38] sm:$0xff]  }
  0x13   : > { %539 = vmatpush1.bf16.msra.mxu0 %v1830_v9  ;;  %1634 = vmatprep.subr.bf16.mxu1 %v1845_v17 }
  0x14   : > { %1730 = vmatprep.subr.bf16.mxu0 %v1855_v33 }
  0x16   : > { %1568 = vmatmul.mubr.msk.bf16.vlgmr.msra.gmra.mrb[0].mxu0 %vm507_vm0, %v1831_v10  ;;  %1635 = vmatpush3.bf16.msra.mxu1 %v1846_v18 }
  0x17   : > { %574 = vmatprep.mubr.bf16.mxu0 %v1877_v2  ;;  %1636 = vmatprep.subr.bf16.mxu1 %v1847_v19 }
  0x18   : > { %1731 = vmatpush3.bf16.msra.mxu0 %v1855_v33 }
  0x19   : > { %1732 = vmatprep.subr.bf16.mxu0 %v1856_v34 }
  0x1a   : > { %1637 = vmatpush3.bf16.msra.mxu1 %v1848_v20 }
  0x1b   : > { %1638 = vmatprep.subr.bf16.mxu1 %v1849_v22 }
  0x1c   : > { %1733 = vmatpush3.bf16.msra.mxu0 %v1856_v34 }
  0x1d   : > { %1734 = vmatprep.subr.bf16.mxu0 %v1857_v35 }
  0x1e   : > { %1569 = vmatmul.mubr.msk.bf16.gmra.mrb[4].mxu0 %vm507_vm0, %v1832_v15  ;;  %1639 = vmatpush3.bf16.msra.mxu1 %v1850_v28 }
  0x1f   : > { %584 = vmatprep.mubr.bf16.mxu0 %v1877_v2  ;;  %1640 = vmatprep.subr.bf16.mxu1 %v1851_v29 }
  0x20   : > { %1735 = vmatpush3.bf16.msra.mxu0 %v1857_v35 }
  0x22   : > { %1641 = vmatpush3.bf16.msra.mxu1 %v1852_v30 }
  0x23   : > { %1642 = vmatprep.subr.bf16.mxu1 %v1853_v31 }
  0x26   : > { %1570 = vmatmul.mubr.msk.bf16.gmra.mrb[8].mxu0 %vm507_vm0, %v1833_v21  ;;  %1643 = vmatpush3.bf16.msra.mxu1 %v1854_v32 }
  0x27   : > { %594 = vmatprep.mubr.bf16.mxu0 %v1877_v2 }
  0x2e   : > { %1571 = vmatmul.mubr.msk.bf16.gmra.mrb[12].mxu0 %vm507_vm0, %v1834_v23 }
  0x2f   : > { %604 = vmatprep.mubr.bf16.mxu0 %v1877_v2 }
  0x36   : > { %1572 = vmatmul.mubr.msk.bf16.gmra.mrb[16].mxu0 %vm507_vm0, %v1835_v24 }
  0x37   : > { %614 = vmatprep.mubr.bf16.mxu0 %v1877_v2 }
  0x3e   : > { %1573 = vmatmul.mubr.msk.bf16.gmra.mrb[20].mxu0 %vm507_vm0, %v1836_v25 }
  0x3f   : > { %624 = vmatprep.mubr.bf16.mxu0 %v1877_v2 }
  0x46   : > { %1574 = vmatmul.mubr.msk.bf16.gmra.mrb[24].mxu0 %vm507_vm0, %v1837_v26 }
  0x47   : > { %634 = vmatprep.mubr.bf16.mxu0 %v1877_v2 }
  0x4e   : > { %1575 = vmatmul.mubr.msk.bf16.gmra.mrb[28].mxu0 %vm507_vm0, %v1838_v27 }
  0xe9   : > { %v566_v43 = vpop.f32.mrb[0].mxu0 }
  0xea   : > { %v567_v44 = vadd.f32 %v566_v43, %v2062_v41  ;;  %v568_v45 = vpop.f32.mrb[1].mxu0 }
  0xeb   : > { %v569_v46 = vadd.f32 %v568_v45, %v2064_v42  ;;  %v570_v47 = vpop.f32.mrb[2].mxu0 }
  0xec   : > { %v571_v48 = vadd.f32 %v570_v47, %v2062_v41  ;;  %v572_v49 = vpop.f32.mrb[3].mxu0  ;;  %v645_v51 = vmax.f32 %v567_v44, 0.0 }
  0xed   : > { %v573_v50 = vadd.f32 %v572_v49, %v2064_v42  ;;  %v646_v53 = vmax.f32 %v569_v46, 0.0 }
  0xee   : > { %v647_v52 = vmax.f32 %v571_v48, 0.0 }
  0xef   : > { %v648_v54 = vmax.f32 %v573_v50, 0.0 }
  0xf0   : > { %v677_v55 = vpack.c.bf16 %v647_v52, %v645_v51 }
  0xf1   : > { %v576_v56 = vpop.f32.mrb[4].mxu0  ;;  %v678_v57 = vpack.c.bf16 %v648_v54, %v646_v53 }
  0xf2   : > { %v577_v58 = vadd.f32 %v576_v56, %v2062_v41  ;;  %v578_v59 = vpop.f32.mrb[5].mxu0 }
  0xf3   : > { %v579_v60 = vadd.f32 %v578_v59, %v2064_v42  ;;  %v580_v61 = vpop.f32.mrb[6].mxu0  ;;  %860 = vmatprep.mubr.bf16.mxu1 %v678_v57 }
  0xf4   : > { %v581_v62 = vadd.f32 %v580_v61, %v2062_v41  ;;  %v582_v63 = vpop.f32.mrb[7].mxu0  ;;  %861 = vmatmul.mubr.bf16.vlgmr.msra.gmra.mrb[0].mxu1 %v677_v55  ;;  %v649_v1 = vmax.f32 %v577_v58, 0.0 }
  0xf5   : > { %v583_v0 = vadd.f32 %v582_v63, %v2064_v42  ;;  %v650_v3 = vmax.f32 %v579_v60, 0.0 }
  0xf6   : > { %v651_v2 = vmax.f32 %v581_v62, 0.0 }
  0xf7   : > { %v652_v4 = vmax.f32 %v583_v0, 0.0 }
  0xf8   : > { %v679_v5 = vpack.c.bf16 %v651_v2, %v649_v1 }
  0xf9   : > { %v680_v6 = vpack.c.bf16 %v652_v4, %v650_v3  ;;  %v586_v7 = vpop.f32.mrb[8].mxu0 }
  0xfa   : > { %v587_v8 = vadd.f32 %v586_v7, %v2062_v41  ;;  %v588_v9 = vpop.f32.mrb[9].mxu0 }
  0xfb   : > { %v589_v10 = vadd.f32 %v588_v9, %v2064_v42  ;;  %v590_v11 = vpop.f32.mrb[10].mxu0  ;;  %868 = vmatprep.mubr.bf16.mxu1 %v680_v6 }
  0xfc   : > { %v591_v12 = vadd.f32 %v590_v11, %v2062_v41  ;;  %v592_v13 = vpop.f32.mrb[11].mxu0  ;;  %869 = vmatmul.mubr.bf16.gmra.mrb[4].mxu1 %v679_v5  ;;  %v653_v15 = vmax.f32 %v587_v8, 0.0 }
  0xfd   : > { %v593_v14 = vadd.f32 %v592_v13, %v2064_v42  ;;  %v654_v17 = vmax.f32 %v589_v10, 0.0 }
  0xfe   : > { %v655_v16 = vmax.f32 %v591_v12, 0.0 }
  0xff   : > { %v656_v18 = vmax.f32 %v593_v14, 0.0 }
 0x100   : > { %v681_v19 = vpack.c.bf16 %v655_v16, %v653_v15 }
 0x101   : > { %v682_v20 = vpack.c.bf16 %v656_v18, %v654_v17  ;;  %v596_v21 = vpop.f32.mrb[12].mxu0 }
 0x102   : > { %v597_v22 = vadd.f32 %v596_v21, %v2062_v41  ;;  %v598_v23 = vpop.f32.mrb[13].mxu0 }
 0x103   : > { %v599_v24 = vadd.f32 %v598_v23, %v2064_v42  ;;  %v600_v25 = vpop.f32.mrb[14].mxu0  ;;  %876 = vmatprep.mubr.bf16.mxu1 %v682_v20 }
 0x104   : > { %v601_v26 = vadd.f32 %v600_v25, %v2062_v41  ;;  %v602_v27 = vpop.f32.mrb[15].mxu0  ;;  %877 = vmatmul.mubr.bf16.gmra.mrb[8].mxu1 %v681_v19  ;;  %v657_v29 = vmax.f32 %v597_v22, 0.0 }
 0x105   : > { %v603_v28 = vadd.f32 %v602_v27, %v2064_v42  ;;  %v658_v31 = vmax.f32 %v599_v24, 0.0 }
 0x106   : > { %v659_v30 = vmax.f32 %v601_v26, 0.0 }
 0x107   : > { %v660_v32 = vmax.f32 %v603_v28, 0.0 }
 0x108   : > { %v683_v33 = vpack.c.bf16 %v659_v30, %v657_v29  ;;  %v1858_v29 = vld [vmem:[%s2223_s5 + $0x18] sm:$0xff]   ;;  %v1861_v30 = vld [vmem:[%s2223_s5 + $0x30] sm:$0xff]  }
 0x109   : > { %v684_v34 = vpack.c.bf16 %v660_v32, %v658_v31  ;;  %v606_v35 = vpop.f32.mrb[16].mxu0  ;;  %1736 = vmatprep.subr.bf16.mxu0 %v1858_v29  ;;  %v1862_v31 = vld [vmem:[%s2223_s5 + $0x38] sm:$0xff]   ;;  %v1863_v32 = vld [vmem:[%s2225_s7] sm:$0xff]  }
 0x10a   : > { %v607_v36 = vadd.f32 %v606_v35, %v2062_v41  ;;  %v608_v37 = vpop.f32.mrb[17].mxu0  ;;  %1737 = vmatpush3.bf16.msra.mxu0 %v1858_v29  ;;  %1762 = vmatprep.subr.bf16.mxu1 %v1863_v32  ;;  %v2122_v35 = vld [vmem:[%s2222_s4] ss:$0 sm:$0xff] }
 0x10b   : > { %v609_v38 = vadd.f32 %v608_v37, %v2064_v42  ;;  %v610_v39 = vpop.f32.mrb[18].mxu0  ;;  %884 = vmatprep.mubr.bf16.mxu1 %v684_v34  ;;  %1763 = vmatpush3.bf16.msra.mxu1 %v1863_v32 }
 0x10c   : > { %v611_v40 = vadd.f32 %v610_v39, %v2062_v41  ;;  %v612_v43 = vpop.f32.mrb[19].mxu0  ;;  %885 = vmatmul.mubr.bf16.gmra.mrb[12].mxu1 %v683_v33  ;;  %v661_v45 = vmax.f32 %v607_v36, 0.0  ;;  %v1864_v33 = vld [vmem:[%s2225_s7 + $0x8] sm:$0xff]  }
 0x10d   : > { %v613_v44 = vadd.f32 %v612_v43, %v2064_v42  ;;  %v662_v47 = vmax.f32 %v609_v38, 0.0  ;;  %1764 = vmatprep.subr.bf16.mxu1 %v1864_v33 }
 0x10e   : > { %v663_v46 = vmax.f32 %v611_v40, 0.0 }
 0x10f   : > { %v664_v48 = vmax.f32 %v613_v44, 0.0  ;;  %1765 = vmatpush3.bf16.msra.mxu1 %v1864_v33 }
 0x110   : > { %v685_v49 = vpack.c.bf16 %v663_v46, %v661_v45 }
 0x111   : > { %v686_v50 = vpack.c.bf16 %v664_v48, %v662_v47  ;;  %v616_v51 = vpop.f32.mrb[20].mxu0 }
 0x112   : > { %v617_v52 = vadd.f32 %v616_v51, %v2062_v41  ;;  %v618_v53 = vpop.f32.mrb[21].mxu0 }
 0x113   : > { %v619_v54 = vadd.f32 %v618_v53, %v2064_v42  ;;  %v620_v55 = vpop.f32.mrb[22].mxu0  ;;  %892 = vmatprep.mubr.bf16.mxu1 %v686_v50 }
 0x114   : > { %v621_v56 = vadd.f32 %v620_v55, %v2062_v41  ;;  %v622_v57 = vpop.f32.mrb[23].mxu0  ;;  %893 = vmatmul.mubr.bf16.gmra.mrb[16].mxu1 %v685_v49  ;;  %v665_v59 = vmax.f32 %v617_v52, 0.0 }
 0x115   : > { %v623_v58 = vadd.f32 %v622_v57, %v2064_v42  ;;  %v666_v61 = vmax.f32 %v619_v54, 0.0 }
 0x116   : > { %v667_v60 = vmax.f32 %v621_v56, 0.0 }
 0x117   : > { %v668_v62 = vmax.f32 %v623_v58, 0.0 }
 0x118   : > { %v687_v63 = vpack.c.bf16 %v667_v60, %v665_v59 }
 0x119   : > { %v688_v0 = vpack.c.bf16 %v668_v62, %v666_v61  ;;  %v626_v1 = vpop.f32.mrb[24].mxu0 }
 0x11a   : > { %v627_v2 = vadd.f32 %v626_v1, %v2062_v41  ;;  %v628_v3 = vpop.f32.mrb[25].mxu0 }
 0x11b   : > { %v629_v4 = vadd.f32 %v628_v3, %v2064_v42  ;;  %v630_v5 = vpop.f32.mrb[26].mxu0  ;;  %900 = vmatprep.mubr.bf16.mxu1 %v688_v0 }
 0x11c   : > { %v631_v6 = vadd.f32 %v630_v5, %v2062_v41  ;;  %v632_v7 = vpop.f32.mrb[27].mxu0  ;;  %901 = vmatmul.mubr.bf16.gmra.mrb[20].mxu1 %v687_v63  ;;  %v669_v9 = vmax.f32 %v627_v2, 0.0 }
 0x11d   : > { %v633_v8 = vadd.f32 %v632_v7, %v2064_v42  ;;  %v670_v11 = vmax.f32 %v629_v4, 0.0 }
 0x11e   : > { %v671_v10 = vmax.f32 %v631_v6, 0.0 }
 0x11f   : > { %v672_v12 = vmax.f32 %v633_v8, 0.0 }
 0x120   : > { %v689_v13 = vpack.c.bf16 %v671_v10, %v669_v9 }
 0x121   : > { %v690_v14 = vpack.c.bf16 %v672_v12, %v670_v11  ;;  %v636_v15 = vpop.f32.mrb[28].mxu0 }
 0x122   : > { %v637_v16 = vadd.f32 %v636_v15, %v2062_v41  ;;  %v638_v17 = vpop.f32.mrb[29].mxu0 }
 0x123   : > { %v639_v18 = vadd.f32 %v638_v17, %v2064_v42  ;;  %v640_v19 = vpop.f32.mrb[30].mxu0  ;;  %908 = vmatprep.mubr.bf16.mxu1 %v690_v14 }
 0x124   : > { %v641_v20 = vadd.f32 %v640_v19, %v2062_v41  ;;  %v642_v21 = vpop.f32.mrb[31].mxu0  ;;  %909 = vmatmul.mubr.bf16.gmra.mrb[24].mxu1 %v689_v13  ;;  %v673_v23 = vmax.f32 %v637_v16, 0.0  ;;  %v1859_v41 = vld [vmem:[%s2223_s5 + $0x20] sm:$0xff]  }
 0x125   : > { %v643_v22 = vadd.f32 %v642_v21, %v2064_v42  ;;  %v674_v25 = vmax.f32 %v639_v18, 0.0  ;;  %1738 = vmatprep.subr.bf16.mxu0 %v1859_v41  ;;  %v1860_v42 = vld [vmem:[%s2223_s5 + $0x28] sm:$0xff]  }
 0x126   : > { %v675_v24 = vmax.f32 %v641_v20, 0.0  ;;  %1739 = vmatpush3.bf16.msra.mxu0 %v1859_v41 }
 0x127   : > { %v676_v26 = vmax.f32 %v643_v22, 0.0  ;;  %1740 = vmatprep.subr.bf16.mxu0 %v1860_v42 }
 0x128   : > { %v691_v27 = vpack.c.bf16 %v675_v24, %v673_v23 }
 0x129   : > { %v692_v28 = vpack.c.bf16 %v676_v26, %v674_v25 }
 0x12a   : > { %1741 = vmatpush3.bf16.msra.mxu0 %v1860_v42 }
 0x12b   : > { %916 = vmatprep.mubr.bf16.mxu1 %v692_v28  ;;  %1742 = vmatprep.subr.bf16.mxu0 %v1861_v30 }
 0x12c   : > { %917 = vmatmul.mubr.bf16.gmra.mrb[28].mxu1 %v691_v27 }
 0x12e   : > { %1743 = vmatpush3.bf16.msra.mxu0 %v1861_v30 }
 0x12f   : > { %1744 = vmatprep.subr.bf16.mxu0 %v1862_v31 }
 0x132   : > { %1745 = vmatpush3.bf16.msra.mxu0 %v1862_v31 }
 0x1c7   : > { %v1644_v34 = vpop.f32.mrb[0].mxu1 }
 0x1c8   : > { %v1645_v36 = vpop.f32.mrb[1].mxu1 }
 0x1c9   : > { %v1646_v37 = vadd.f32 %v1645_v36, %v1644_v34  ;;  %v1647_v38 = vpop.f32.mrb[2].mxu1 }
 0x1ca   : > { %v1648_v39 = vpop.f32.mrb[3].mxu1 }
 0x1cb   : > { %v863_v40 = vadd.f32 %v1646_v37, %v2122_v35  ;;  %v1649_v43 = vadd.f32 %v1648_v39, %v1647_v38 }
 0x1cd   : > { %v866_v44 = vadd.f32 %v1649_v43, %v2122_v35  ;;  %v925_v45 = vmax.f32 %v863_v40, 0.0 }
 0x1cf   : > { %v926_v46 = vmax.f32 %v866_v44, 0.0  ;;  %v1650_v47 = vpop.f32.mrb[4].mxu1 }
 0x1d0   : > { %v1651_v48 = vpop.f32.mrb[5].mxu1 }
 0x1d1   : > { %v1652_v49 = vadd.f32 %v1651_v48, %v1650_v47  ;;  %v1653_v50 = vpop.f32.mrb[6].mxu1  ;;  %v941_v51 = vpack.c.bf16 %v926_v46, %v925_v45 }
 0x1d2   : > { %v1654_v52 = vpop.f32.mrb[7].mxu1 }
 0x1d3   : > { %v871_v53 = vadd.f32 %v1652_v49, %v2122_v35  ;;  %v1655_v54 = vadd.f32 %v1654_v52, %v1653_v50  ;;  %1746 = vmatprep.mubr.bf16.mxu0 %v941_v51 }
 0x1d5   : > { %v874_v55 = vadd.f32 %v1655_v54, %v2122_v35  ;;  %v927_v56 = vmax.f32 %v871_v53, 0.0 }
 0x1d7   : > { %v928_v57 = vmax.f32 %v874_v55, 0.0  ;;  %v1656_v58 = vpop.f32.mrb[8].mxu1 }
 0x1d8   : > { %v1657_v59 = vpop.f32.mrb[9].mxu1 }
 0x1d9   : > { %v942_v60 = vpack.c.bf16 %v928_v57, %v927_v56  ;;  %v1658_v61 = vadd.f32 %v1657_v59, %v1656_v58  ;;  %v1659_v62 = vpop.f32.mrb[10].mxu1 }
 0x1da   : > { %v1660_v63 = vpop.f32.mrb[11].mxu1 }
 0x1db   : > { %v879_v0 = vadd.f32 %v1658_v61, %v2122_v35  ;;  %v1661_v1 = vadd.f32 %v1660_v63, %v1659_v62  ;;  %1747 = vmatmul.mubr.bf16.vlgmr.msra.gmra.mrb[32].mxu0 %v942_v60  ;;  %v1865_v62 = vld [vmem:[%s2225_s7 + $0x10] sm:$0xff]   ;;  %v1866_v63 = vld [vmem:[%s2225_s7 + $0x18] sm:$0xff]  }
 0x1dc   : > { %1766 = vmatprep.subr.bf16.mxu1 %v1865_v62 }
 0x1dd   : > { %v882_v2 = vadd.f32 %v1661_v1, %v2122_v35  ;;  %v929_v3 = vmax.f32 %v879_v0, 0.0  ;;  %1767 = vmatpush3.bf16.msra.mxu1 %v1865_v62 }
 0x1de   : > { %1768 = vmatprep.subr.bf16.mxu1 %v1866_v63 }
 0x1df   : > { %v930_v4 = vmax.f32 %v882_v2, 0.0  ;;  %v1662_v5 = vpop.f32.mrb[12].mxu1 }
 0x1e0   : > { %v1663_v6 = vpop.f32.mrb[13].mxu1 }
 0x1e1   : > { %v1664_v7 = vadd.f32 %v1663_v6, %v1662_v5  ;;  %v1665_v8 = vpop.f32.mrb[14].mxu1  ;;  %v943_v9 = vpack.c.bf16 %v930_v4, %v929_v3  ;;  %1769 = vmatpush3.bf16.msra.mxu1 %v1866_v63 }
 0x1e2   : > { %v1666_v10 = vpop.f32.mrb[15].mxu1 }
 0x1e3   : > { %v887_v11 = vadd.f32 %v1664_v7, %v2122_v35  ;;  %v1667_v12 = vadd.f32 %v1666_v10, %v1665_v8  ;;  %1750 = vmatprep.mubr.bf16.mxu0 %v943_v9 }
 0x1e5   : > { %v890_v13 = vadd.f32 %v1667_v12, %v2122_v35  ;;  %v931_v14 = vmax.f32 %v887_v11, 0.0 }
 0x1e7   : > { %v932_v15 = vmax.f32 %v890_v13, 0.0  ;;  %v1668_v16 = vpop.f32.mrb[16].mxu1 }
 0x1e8   : > { %v1669_v17 = vpop.f32.mrb[17].mxu1 }
 0x1e9   : > { %v1670_v18 = vadd.f32 %v1669_v17, %v1668_v16  ;;  %v1671_v19 = vpop.f32.mrb[18].mxu1  ;;  %v944_v20 = vpack.c.bf16 %v932_v15, %v931_v14 }
 0x1ea   : > { %v1672_v21 = vpop.f32.mrb[19].mxu1 }
 0x1eb   : > { %v895_v22 = vadd.f32 %v1670_v18, %v2122_v35  ;;  %v1673_v23 = vadd.f32 %v1672_v21, %v1671_v19  ;;  %1751 = vmatmul.mubr.bf16.gmra.mrb[36].mxu0 %v944_v20 }
 0x1ed   : > { %v898_v24 = vadd.f32 %v1673_v23, %v2122_v35  ;;  %v933_v25 = vmax.f32 %v895_v22, 0.0 }
 0x1ef   : > { %v934_v26 = vmax.f32 %v898_v24, 0.0  ;;  %v1674_v27 = vpop.f32.mrb[20].mxu1 }
 0x1f0   : > { %v1675_v28 = vpop.f32.mrb[21].mxu1 }
 0x1f1   : > { %v1676_v29 = vadd.f32 %v1675_v28, %v1674_v27  ;;  %v1677_v41 = vpop.f32.mrb[22].mxu1  ;;  %v945_v42 = vpack.c.bf16 %v934_v26, %v933_v25 }
 0x1f2   : > { %v1678_v30 = vpop.f32.mrb[23].mxu1 }
 0x1f3   : > { %v903_v31 = vadd.f32 %v1676_v29, %v2122_v35  ;;  %v1679_v32 = vadd.f32 %v1678_v30, %v1677_v41  ;;  %1754 = vmatprep.mubr.bf16.mxu0 %v945_v42 }
 0x1f5   : > { %v906_v33 = vadd.f32 %v1679_v32, %v2122_v35  ;;  %v935_v34 = vmax.f32 %v903_v31, 0.0 }
 0x1f7   : > { %v936_v36 = vmax.f32 %v906_v33, 0.0  ;;  %v1680_v37 = vpop.f32.mrb[24].mxu1 }
 0x1f8   : > { %v1681_v38 = vpop.f32.mrb[25].mxu1 }
 0x1f9   : > { %v1682_v39 = vadd.f32 %v1681_v38, %v1680_v37  ;;  %v1683_v40 = vpop.f32.mrb[26].mxu1  ;;  %v946_v43 = vpack.c.bf16 %v936_v36, %v935_v34 }
 0x1fa   : > { %v1684_v44 = vpop.f32.mrb[27].mxu1 }
 0x1fb   : > { %v911_v45 = vadd.f32 %v1682_v39, %v2122_v35  ;;  %v1685_v46 = vadd.f32 %v1684_v44, %v1683_v40  ;;  %1755 = vmatmul.mubr.bf16.gmra.mrb[40].mxu0 %v946_v43 }
 0x1fd   : > { %v914_v47 = vadd.f32 %v1685_v46, %v2122_v35  ;;  %v937_v48 = vmax.f32 %v911_v45, 0.0 }
 0x1ff   : > { %v938_v49 = vmax.f32 %v914_v47, 0.0  ;;  %v1686_v50 = vpop.f32.mrb[28].mxu1 }
 0x200   : > { %v1687_v51 = vpop.f32.mrb[29].mxu1 }
 0x201   : > { %v1688_v52 = vadd.f32 %v1687_v51, %v1686_v50  ;;  %v1689_v53 = vpop.f32.mrb[30].mxu1  ;;  %v947_v54 = vpack.c.bf16 %v938_v49, %v937_v48 }
 0x202   : > { %v1690_v55 = vpop.f32.mrb[31].mxu1 }
 0x203   : > { %v919_v56 = vadd.f32 %v1688_v52, %v2122_v35  ;;  %v1691_v57 = vadd.f32 %v1690_v55, %v1689_v53  ;;  %1758 = vmatprep.mubr.bf16.mxu0 %v947_v54 }
 0x205   : > { %v922_v58 = vadd.f32 %v1691_v57, %v2122_v35  ;;  %v939_v59 = vmax.f32 %v919_v56, 0.0  ;;  %v1593_v35 = vld [vmem:[%s2224_s6] ss:$0 sm:$0xff] }
 0x206   : > { %v1867_v57 = vld [vmem:[%s2227_s9] sm:$0xff]  }
 0x207   : > { %v940_v60 = vmax.f32 %v922_v58, 0.0  ;;  %1786 = vmatprep.subr.bf16.mxu0 %v1867_v57  ;;  %1806 = vmatprep.subr.bf16.mxu1 %v1867_v57  ;;  %v1868_v58 = vld [vmem:[%s2227_s9 + $0x8] sm:$0xff]  }
 0x208   : > { %1787 = vmatpush3.bf16.msra.mxu0 %v1867_v57 }
 0x209   : > { %v948_v61 = vpack.c.bf16 %v940_v60, %v939_v59  ;;  %1788 = vmatprep.subr.bf16.mxu0 %v1868_v58  ;;  %v1602_v59 = vld [vmem:[%s2226_s8] ss:$0 sm:$0xff] }
 0x20b   : > { %1759 = vmatmul.mubr.bf16.gmra.mrb[44].mxu0 %v948_v61 }
 0x20c   : > { %1789 = vmatpush3.bf16.msra.mxu0 %v1868_v58 }
 0x2ae   : > { %v1748_v0 = vpop.f32.mrb[32].mxu0 }
 0x2af   : > { %v1063_v1 = vadd.f32 %v1748_v0, %v1593_v35  ;;  %v1054_v2 = vpop.f32.mrb[33].mxu0 }
 0x2b0   : > { %v1055_v3 = vadd.f32 %v1593_v35, %v1054_v2  ;;  %v1749_v4 = vpop.f32.mrb[34].mxu0 }
 0x2b1   : > { %v1066_v5 = vadd.f32 %v1749_v4, %v1593_v35  ;;  %v1057_v6 = vpop.f32.mrb[35].mxu0  ;;  %v1119_v8 = vmax.f32 %v1063_v1, 0.0 }
 0x2b2   : > { %v1058_v7 = vadd.f32 %v1593_v35, %v1057_v6  ;;  %v1117_v10 = vmax.f32 %v1055_v3, 0.0 }
 0x2b3   : > { %v1120_v9 = vmax.f32 %v1066_v5, 0.0 }
 0x2b4   : > { %v1118_v11 = vmax.f32 %v1058_v7, 0.0 }
 0x2b5   : > { %v1134_v12 = vpack.c.bf16 %v1120_v9, %v1119_v8 }
 0x2b6   : > { %v1133_v13 = vpack.c.bf16 %v1118_v11, %v1117_v10 }
 0x2b8   : > { %1770 = vmatprep.mubr.msk.bf16.mxu1 %vm507_vm0, %v1133_v13 }
 0x2b9   : > { %1771 = vmatmul.mubr.msk.bf16.vlgmr.msra.gmra.mrb[32].mxu1 %vm507_vm0, %v1134_v12 }
 0x2ba   : > { %1808 = vmatpush3.bf16.msra.mxu1 %v1867_v57 }
 0x2bb   : > { %1807 = vmatprep.subr.bf16.mxu1 %v1868_v58 }
 0x2be   : > { %v1752_v14 = vpop.f32.mrb[36].mxu0  ;;  %1809 = vmatpush3.bf16.msra.mxu1 %v1868_v58 }
 0x2bf   : > { %v1079_v15 = vadd.f32 %v1752_v14, %v1593_v35  ;;  %v1070_v16 = vpop.f32.mrb[37].mxu0 }
 0x2c0   : > { %v1071_v17 = vadd.f32 %v1593_v35, %v1070_v16  ;;  %v1753_v18 = vpop.f32.mrb[38].mxu0 }
 0x2c1   : > { %v1082_v19 = vadd.f32 %v1753_v18, %v1593_v35  ;;  %v1073_v20 = vpop.f32.mrb[39].mxu0  ;;  %v1123_v22 = vmax.f32 %v1079_v15, 0.0 }
 0x2c2   : > { %v1074_v21 = vadd.f32 %v1593_v35, %v1073_v20  ;;  %v1121_v24 = vmax.f32 %v1071_v17, 0.0 }
 0x2c3   : > { %v1124_v23 = vmax.f32 %v1082_v19, 0.0 }
 0x2c4   : > { %v1122_v25 = vmax.f32 %v1074_v21, 0.0 }
 0x2c5   : > { %v1136_v26 = vpack.c.bf16 %v1124_v23, %v1123_v22 }
 0x2c6   : > { %v1135_v27 = vpack.c.bf16 %v1122_v25, %v1121_v24 }
 0x2c8   : > { %1774 = vmatprep.mubr.msk.bf16.mxu1 %vm507_vm0, %v1135_v27 }
 0x2c9   : > { %1775 = vmatmul.mubr.msk.bf16.gmra.mrb[36].mxu1 %vm507_vm0, %v1136_v26 }
 0x2ce   : > { %v1756_v28 = vpop.f32.mrb[40].mxu0 }
 0x2cf   : > { %v1095_v29 = vadd.f32 %v1756_v28, %v1593_v35  ;;  %v1086_v41 = vpop.f32.mrb[41].mxu0 }
 0x2d0   : > { %v1087_v42 = vadd.f32 %v1593_v35, %v1086_v41  ;;  %v1757_v30 = vpop.f32.mrb[42].mxu0 }
 0x2d1   : > { %v1098_v31 = vadd.f32 %v1757_v30, %v1593_v35  ;;  %v1089_v32 = vpop.f32.mrb[43].mxu0  ;;  %v1127_v34 = vmax.f32 %v1095_v29, 0.0 }
 0x2d2   : > { %v1090_v33 = vadd.f32 %v1593_v35, %v1089_v32  ;;  %v1125_v37 = vmax.f32 %v1087_v42, 0.0 }
 0x2d3   : > { %v1128_v36 = vmax.f32 %v1098_v31, 0.0 }
 0x2d4   : > { %v1126_v38 = vmax.f32 %v1090_v33, 0.0 }
 0x2d5   : > { %v1138_v39 = vpack.c.bf16 %v1128_v36, %v1127_v34 }
 0x2d6   : > { %v1137_v40 = vpack.c.bf16 %v1126_v38, %v1125_v37 }
 0x2d8   : > { %1778 = vmatprep.mubr.msk.bf16.mxu1 %vm507_vm0, %v1137_v40 }
 0x2d9   : > { %1779 = vmatmul.mubr.msk.bf16.gmra.mrb[40].mxu1 %vm507_vm0, %v1138_v39 }
 0x2de   : > { %v1760_v43 = vpop.f32.mrb[44].mxu0 }
 0x2df   : > { %v1111_v44 = vadd.f32 %v1760_v43, %v1593_v35  ;;  %v1102_v45 = vpop.f32.mrb[45].mxu0 }
 0x2e0   : > { %v1103_v46 = vadd.f32 %v1593_v35, %v1102_v45  ;;  %v1761_v47 = vpop.f32.mrb[46].mxu0 }
 0x2e1   : > { %v1114_v48 = vadd.f32 %v1761_v47, %v1593_v35  ;;  %v1105_v49 = vpop.f32.mrb[47].mxu0  ;;  %v1131_v51 = vmax.f32 %v1111_v44, 0.0 }
 0x2e2   : > { %v1106_v50 = vadd.f32 %v1593_v35, %v1105_v49  ;;  %v1129_v53 = vmax.f32 %v1103_v46, 0.0 }
 0x2e3   : > { %v1132_v52 = vmax.f32 %v1114_v48, 0.0 }
 0x2e4   : > { %v1130_v54 = vmax.f32 %v1106_v50, 0.0 }
 0x2e5   : > { %v1140_v55 = vpack.c.bf16 %v1132_v52, %v1131_v51  ;;  %v1615_v52 = vld [vmem:[%s2228_s10] ss:$0 sm:$0xff] }
 0x2e6   : > { %v1139_v56 = vpack.c.bf16 %v1130_v54, %v1129_v53 }
 0x2e8   : > { %1782 = vmatprep.mubr.msk.bf16.mxu1 %vm507_vm0, %v1139_v56 }
 0x2e9   : > { %1783 = vmatmul.mubr.msk.bf16.gmra.mrb[44].mxu1 %vm507_vm0, %v1140_v55 }
 0x38c   : > { %v1772_v60 = vpop.f32.mrb[32].mxu1 }
 0x38d   : > { %v1247_v61 = vadd.f32 %v1772_v60, %v1602_v59  ;;  %v1238_v62 = vpop.f32.mrb[33].mxu1 }
 0x38e   : > { %v1239_v63 = vadd.f32 %v1602_v59, %v1238_v62  ;;  %v1773_v35 = vpop.f32.mrb[34].mxu1 }
 0x38f   : > { %v1250_v0 = vadd.f32 %v1773_v35, %v1602_v59  ;;  %v1241_v1 = vpop.f32.mrb[35].mxu1  ;;  %v1303_v3 = vmax.f32 %v1247_v61, 0.0 }
 0x390   : > { %v1242_v2 = vadd.f32 %v1602_v59, %v1241_v1  ;;  %v1301_v5 = vmax.f32 %v1239_v63, 0.0 }
 0x391   : > { %v1304_v4 = vmax.f32 %v1250_v0, 0.0 }
 0x392   : > { %v1302_v6 = vmax.f32 %v1242_v2, 0.0 }
 0x393   : > { %v1318_v7 = vpack.c.bf16 %v1304_v4, %v1303_v3 }
 0x394   : > { %v1317_v8 = vpack.c.bf16 %v1302_v6, %v1301_v5 }
 0x396   : > { %1790 = vmatprep.mubr.msk.bf16.mxu0 %vm1348_vm1, %v1317_v8 }
 0x397   : > { %1791 = vmatmul.mubr.msk.bf16.vlgmr.msra.gmra.mrb[48].mxu0 %vm1348_vm1, %v1318_v7 }
 0x39c   : > { %v1776_v9 = vpop.f32.mrb[36].mxu1 }
 0x39d   : > { %v1263_v10 = vadd.f32 %v1776_v9, %v1602_v59  ;;  %v1254_v11 = vpop.f32.mrb[37].mxu1 }
 0x39e   : > { %v1255_v12 = vadd.f32 %v1602_v59, %v1254_v11  ;;  %v1777_v13 = vpop.f32.mrb[38].mxu1 }
 0x39f   : > { %v1266_v14 = vadd.f32 %v1777_v13, %v1602_v59  ;;  %v1257_v15 = vpop.f32.mrb[39].mxu1  ;;  %v1307_v17 = vmax.f32 %v1263_v10, 0.0 }
 0x3a0   : > { %v1258_v16 = vadd.f32 %v1602_v59, %v1257_v15  ;;  %v1305_v19 = vmax.f32 %v1255_v12, 0.0 }
 0x3a1   : > { %v1308_v18 = vmax.f32 %v1266_v14, 0.0 }
 0x3a2   : > { %v1306_v20 = vmax.f32 %v1258_v16, 0.0 }
 0x3a3   : > { %v1320_v21 = vpack.c.bf16 %v1308_v18, %v1307_v17 }
 0x3a4   : > { %v1319_v22 = vpack.c.bf16 %v1306_v20, %v1305_v19 }
 0x3a6   : > { %1794 = vmatprep.mubr.msk.bf16.mxu0 %vm1348_vm1, %v1319_v22 }
 0x3a7   : > { %1795 = vmatmul.mubr.msk.bf16.gmra.mrb[52].mxu0 %vm1348_vm1, %v1320_v21 }
 0x3ac   : > { %v1780_v23 = vpop.f32.mrb[40].mxu1 }
 0x3ad   : > { %v1279_v24 = vadd.f32 %v1780_v23, %v1602_v59  ;;  %v1270_v25 = vpop.f32.mrb[41].mxu1 }
 0x3ae   : > { %v1271_v26 = vadd.f32 %v1602_v59, %v1270_v25  ;;  %v1781_v27 = vpop.f32.mrb[42].mxu1 }
 0x3af   : > { %v1282_v28 = vadd.f32 %v1781_v27, %v1602_v59  ;;  %v1273_v29 = vpop.f32.mrb[43].mxu1  ;;  %v1311_v42 = vmax.f32 %v1279_v24, 0.0 }
 0x3b0   : > { %v1274_v41 = vadd.f32 %v1602_v59, %v1273_v29  ;;  %v1309_v31 = vmax.f32 %v1271_v26, 0.0 }
 0x3b1   : > { %v1312_v30 = vmax.f32 %v1282_v28, 0.0 }
 0x3b2   : > { %v1310_v32 = vmax.f32 %v1274_v41, 0.0 }
 0x3b3   : > { %v1322_v33 = vpack.c.bf16 %v1312_v30, %v1311_v42 }
 0x3b4   : > { %v1321_v34 = vpack.c.bf16 %v1310_v32, %v1309_v31 }
 0x3b6   : > { %1798 = vmatprep.mubr.msk.bf16.mxu0 %vm1348_vm1, %v1321_v34 }
 0x3b7   : > { %1799 = vmatmul.mubr.msk.bf16.gmra.mrb[56].mxu0 %vm1348_vm1, %v1322_v33 }
 0x3bc   : > { %v1784_v36 = vpop.f32.mrb[44].mxu1 }
 0x3bd   : > { %v1295_v37 = vadd.f32 %v1784_v36, %v1602_v59  ;;  %v1286_v38 = vpop.f32.mrb[45].mxu1 }
 0x3be   : > { %v1287_v39 = vadd.f32 %v1602_v59, %v1286_v38  ;;  %v1785_v40 = vpop.f32.mrb[46].mxu1 }
 0x3bf   : > { %v1298_v43 = vadd.f32 %v1785_v40, %v1602_v59  ;;  %v1289_v44 = vpop.f32.mrb[47].mxu1  ;;  %v1315_v46 = vmax.f32 %v1295_v37, 0.0 }
 0x3c0   : > { %v1290_v45 = vadd.f32 %v1602_v59, %v1289_v44  ;;  %v1313_v48 = vmax.f32 %v1287_v39, 0.0 }
 0x3c1   : > { %v1316_v47 = vmax.f32 %v1298_v43, 0.0 }
 0x3c2   : > { %v1314_v49 = vmax.f32 %v1290_v45, 0.0 }
 0x3c3   : > { %v1324_v50 = vpack.c.bf16 %v1316_v47, %v1315_v46 }
 0x3c4   : > { %v1323_v51 = vpack.c.bf16 %v1314_v49, %v1313_v48 }
 0x3c6   : > { %1802 = vmatprep.mubr.msk.bf16.mxu1 %vm1348_vm1, %v1323_v51 }
 0x3c7   : > { %1803 = vmatmul.mubr.msk.bf16.vlgmr.msra.gmra.mrb[48].mxu1 %vm1348_vm1, %v1324_v50 }
 0x46a   : > { %v1792_v53 = vpop.f32.mrb[48].mxu0 }
 0x46b   : > { %v1416_v54 = vadd.f32 %v1792_v53, %v1615_v52  ;;  %v1407_v55 = vpop.f32.mrb[49].mxu0 }
 0x46c   : > { %v1408_v56 = vadd.f32 %v1615_v52, %v1407_v55  ;;  %v1793_v57 = vpop.f32.mrb[50].mxu0 }
 0x46d   : > { %1473 = vst.msk [vmem:[%s2181_s29 + $0x10] sm:$0xff] %vm1470_vm2, %v1416_v54  ;;  %v1419_v58 = vadd.f32 %v1793_v57, %v1615_v52  ;;  %v1410_v59 = vpop.f32.mrb[51].mxu0 }
 0x46e   : > { %1471 = vst.msk [vmem:[%s2181_s29] sm:$0xff] %vm1470_vm2, %v1408_v56  ;;  %v1411_v60 = vadd.f32 %v1615_v52, %v1410_v59 }
 0x46f   : > { %1474 = vst.msk [vmem:[%s2181_s29 + $0x18] sm:$0xff] %vm1470_vm2, %v1419_v58 }
 0x470   : > { %1472 = vst.msk [vmem:[%s2181_s29 + $0x8] sm:$0xff] %vm1470_vm2, %v1411_v60 }
 0x47a   : > { %v1796_v61 = vpop.f32.mrb[52].mxu0 }
 0x47b   : > { %v1432_v62 = vadd.f32 %v1796_v61, %v1615_v52  ;;  %v1423_v63 = vpop.f32.mrb[53].mxu0 }
 0x47c   : > { %v1424_v35 = vadd.f32 %v1615_v52, %v1423_v63  ;;  %v1797_v0 = vpop.f32.mrb[54].mxu0 }
 0x47d   : > { %1477 = vst.msk [vmem:[%s2181_s29 + $0x30] sm:$0xff] %vm1470_vm2, %v1432_v62  ;;  %v1435_v1 = vadd.f32 %v1797_v0, %v1615_v52  ;;  %v1426_v2 = vpop.f32.mrb[55].mxu0 }
 0x47e   : > { %1475 = vst.msk [vmem:[%s2181_s29 + $0x20] sm:$0xff] %vm1470_vm2, %v1424_v35  ;;  %v1427_v3 = vadd.f32 %v1615_v52, %v1426_v2 }
 0x47f   : > { %1478 = vst.msk [vmem:[%s2181_s29 + $0x38] sm:$0xff] %vm1470_vm2, %v1435_v1 }
 0x480   : > { %1476 = vst.msk [vmem:[%s2181_s29 + $0x28] sm:$0xff] %vm1470_vm2, %v1427_v3 }
 0x48a   : > { %v1800_v4 = vpop.f32.mrb[56].mxu0 }
 0x48b   : > { %v1448_v5 = vadd.f32 %v1800_v4, %v1615_v52  ;;  %v1439_v6 = vpop.f32.mrb[57].mxu0 }
 0x48c   : > { %v1440_v7 = vadd.f32 %v1615_v52, %v1439_v6  ;;  %v1801_v8 = vpop.f32.mrb[58].mxu0 }
 0x48d   : > { %1481 = vst.msk [vmem:[%s2181_s29 + $0x50] sm:$0xff] %vm1470_vm2, %v1448_v5  ;;  %v1451_v9 = vadd.f32 %v1801_v8, %v1615_v52  ;;  %v1442_v10 = vpop.f32.mrb[59].mxu0 }
 0x48e   : > { %1479 = vst.msk [vmem:[%s2181_s29 + $0x40] sm:$0xff] %vm1470_vm2, %v1440_v7  ;;  %v1443_v11 = vadd.f32 %v1615_v52, %v1442_v10 }
 0x48f   : > { %1482 = vst.msk [vmem:[%s2181_s29 + $0x58] sm:$0xff] %vm1470_vm2, %v1451_v9 }
 0x490   : > { %1480 = vst.msk [vmem:[%s2181_s29 + $0x48] sm:$0xff] %vm1470_vm2, %v1443_v11 }
 0x49a   : > { %v1804_v12 = vpop.f32.mrb[48].mxu1 }
 0x49b   : > { %v1464_v13 = vadd.f32 %v1804_v12, %v1615_v52  ;;  %v1455_v14 = vpop.f32.mrb[49].mxu1 }
 0x49c   : > { %v1456_v15 = vadd.f32 %v1615_v52, %v1455_v14  ;;  %v1805_v16 = vpop.f32.mrb[50].mxu1 }
 0x49d   : > { %1485 = vst.msk [vmem:[%s2181_s29 + $0x70] sm:$0xff] %vm1470_vm2, %v1464_v13  ;;  %v1467_v17 = vadd.f32 %v1805_v16, %v1615_v52  ;;  %v1458_v18 = vpop.f32.mrb[51].mxu1 }
 0x49e   : > { %1483 = vst.msk [vmem:[%s2181_s29 + $0x60] sm:$0xff] %vm1470_vm2, %v1456_v15  ;;  %v1459_v19 = vadd.f32 %v1615_v52, %v1458_v18 }
 0x49f   : > { %1486 = vst.msk [vmem:[%s2181_s29 + $0x78] sm:$0xff] %vm1470_vm2, %v1467_v17 }
 0x4a0   : > { %1484 = vst.msk [vmem:[%s2181_s29 + $0x68] sm:$0xff] %vm1470_vm2, %v1459_v19 }
 0x4a1 PF: > { %s21_s17 = sadd.s32 1, %s1875_s17  }
 0x4a2   : > { %p18_p4 = scmp.ge.s32.totalorder %s21_s17, 5  }
 0x4a4   :  { %20 = sbr.rel (!%p18_p4) target bundleno = 1 (0x1), region = 94 }

</bundles_post_ra>
